<compile_context>
chip_gen: v7x
topology: tpu7x:2x2x1
jax: 0.10.0
libtpu: 0.0.40
codegen_flags: <defaults>
</compile_context>

<pallas_src>
import numpy as np
import jax
import jax.numpy as jnp
from jax.experimental import pallas as pl
from jax.experimental.pallas import tpu as pltpu

LANE = 128          # TPU lane width: spatial tiles are multiples of this
EPS = 1e-5          # BatchNorm eps (eval mode, running statistics)
CUBIC_A = -0.75     # PyTorch bicubic coefficient


def _round_up(x, m):
    return (x + m - 1) // m * m


# ---------------------------------------------------------------------------
# Pallas kernels: fused (W @ patches) + BN shift + per-channel PReLU
#   w:(Cout,K)  p:(K,tm)  b,a:(Cout,1)  o:(Cout|Cfin, tm)
# ---------------------------------------------------------------------------
def _conv_bn_prelu_kernel(w_ref, p_ref, b_ref, a_ref, o_ref):
    z = jnp.dot(w_ref[...], p_ref[...], preferred_element_type=jnp.float32)
    z = z + b_ref[...]                                   # folded BN shift
    o_ref[...] = jnp.where(z > 0, z, z * a_ref[...]).astype(o_ref.dtype)


def _conv_bn_prelu_proj_kernel(w_ref, p_ref, b_ref, a_ref, wf_ref, o_ref):
    z = jnp.dot(w_ref[...], p_ref[...], preferred_element_type=jnp.float32)
    z = z + b_ref[...]
    y = jnp.where(z > 0, z, z * a_ref[...])              # PReLU
    # fused trailing 1x1 conv (pure channel matmul)
    o_ref[...] = jnp.dot(wf_ref[...], y,
                         preferred_element_type=jnp.float32).astype(o_ref.dtype)


def fused_conv_bn_prelu_matmul(w_mat, patches, bias, alpha, w_proj=None):
    """out[n, m] = PReLU(sum_k w_mat[n,k] * patches[k,m] + bias[n]; alpha[n]),
       optionally followed by a fused 1x1 projection out = w_proj @ PReLU(...)."""
    Cout, K = w_mat.shape
    K2, M = patches.shape
    assert K == K2, (K, K2)

    # Spatial (lane) tile: lane-dense whenever M >= 128; tiny layers take the
    # full extent (block dim == full array dim is always legal).
    if M >= 1024:
        tm = 512
    elif M >= LANE:
        tm = LANE
    else:
        tm = M
    MP = _round_up(M, tm)
    if MP != M:
        patches = jnp.pad(patches, ((0, 0), (0, MP - M)))
    grid = (MP // tm,)

    Nout = Cout if w_proj is None else w_proj.shape[0]
    flops = 2 * Cout * K * MP + (0 if w_proj is None else 2 * Nout * Cout * MP)
    bytes_acc = 4 * (Cout * K + K * MP + Nout * MP + 2 * Cout
                     + (0 if w_proj is None else Nout * Cout))

    in_specs = [
        pl.BlockSpec((Cout, K), lambda i: (0, 0)),       # folded conv weight (resident)
        pl.BlockSpec((K, tm), lambda i: (0, i)),         # im2col patches (streamed)
        pl.BlockSpec((Cout, 1), lambda i: (0, 0)),       # BN shift
        pl.BlockSpec((Cout, 1), lambda i: (0, 0)),       # PReLU alpha
    ]
    args = [w_mat, patches, bias, alpha]
    if w_proj is None:
        kernel = _conv_bn_prelu_kernel
    else:
        kernel = _conv_bn_prelu_proj_kernel
        in_specs.append(pl.BlockSpec((Nout, Cout), lambda i: (0, 0)))
        args.append(w_proj)

    out = pl.pallas_call(
        kernel,
        out_shape=jax.ShapeDtypeStruct((Nout, MP), jnp.float32),
        grid_spec=pltpu.PrefetchScalarGridSpec(
            num_scalar_prefetch=0,
            grid=grid,
            in_specs=in_specs,
            out_specs=pl.BlockSpec((Nout, tm), lambda i: (0, i)),
        ),
        compiler_params=pltpu.CompilerParams(
            dimension_semantics=("parallel",),
            vmem_limit_bytes=32 * 1024 * 1024),
        cost_estimate=pl.CostEstimate(
            flops=int(flops), transcendentals=0, bytes_accessed=int(bytes_acc)),
    )(*args)
    if MP != M:
        out = out[:, :M]
    return out


# ---------------------------------------------------------------------------
# Conv layer wrapper (channels-major activations: (C, B, H, W))
# ---------------------------------------------------------------------------
def conv3x3_bn_prelu(x_cbhw, w_mat, bias, alpha, stride, w_proj=None):
    """x: (Cin, B, Hi, Wi) -> (Nout, B, Ho, Wo)."""
    Cin, B, Hi, Wi = x_cbhw.shape
    Ho = (Hi + 2 - 3) // stride + 1
    Wo = (Wi + 2 - 3) // stride + 1
    cin_p = _round_up(Cin, 8)                 # sublane-align the contraction dim
    # TODO(synk): halo padding + im2col patch extraction is plain-JAX glue; a
    # production kernel would keep the 1-pixel halo inside overlapping spatial
    # blocks to avoid this extra HBM materialization.
    xp = jnp.pad(x_cbhw, ((0, cin_p - Cin), (0, 0), (1, 1), (1, 1)))
    taps = []
    for dy in range(3):
        for dx in range(3):
            taps.append(xp[:, :, dy:dy + stride * (Ho - 1) + 1:stride,
                           dx:dx + stride * (Wo - 1) + 1:stride])
    patches = jnp.concatenate(taps, axis=0).reshape(9 * cin_p, B * Ho * Wo)
    out = fused_conv_bn_prelu_matmul(w_mat, patches, bias, alpha, w_proj)
    return out.reshape(-1, B, Ho, Wo)


# ---------------------------------------------------------------------------
# Parameter folding (BN scale into conv weights), (kh,kw,cin)-row ordering
# ---------------------------------------------------------------------------
def fold_conv_bn_prelu_params(w_oihw, gamma, beta, mean, var, alpha):
    """(Cout,Cin,3,3) conv weight + BN stats + PReLU alpha
       -> (Cout, 9*cin_p) folded weight, bias (Cout,1), alpha (Cout,1)."""
    cout, cin = w_oihw.shape[0], w_oihw.shape[1]
    cin_p = _round_up(cin, 8)
    s = gamma / jnp.sqrt(var + EPS)                       # BN scale
    w = jnp.transpose(w_oihw, (0, 2, 3, 1))               # (Cout, kh, kw, Cin)
    if cin_p != cin:
        w = jnp.pad(w, ((0, 0), (0, 0), (0, 0), (0, cin_p - cin)))
    w_mat = w.reshape(cout, 9 * cin_p) * s[:, None]
    bias = (beta - mean * s)[:, None]
    return w_mat, bias, alpha[:, None]


def fold_conv1x1_params(w_oihw):
    """Final 1x1 conv: (Cout,Cin,1,1) -> (Cout, Cin) channel matmul weight."""
    return w_oihw[:, :, 0, 0]


# ---------------------------------------------------------------------------
# Bicubic upsample (align_corners=True), PyTorch semantics (a = -0.75)
# ---------------------------------------------------------------------------
def _bicubic_matrix(n_in, n_out, a=CUBIC_A):
    def c1(t):  # |t| <= 1
        return ((a + 2.0) * t - (a + 3.0)) * t * t + 1.0

    def c2(t):  # 1 < |t| < 2
        return (((a * t - 5.0 * a) * t + 8.0 * a) * t) - 4.0 * a

    mat = np.zeros((n_out, n_in), dtype=np.float64)
    scale = 0.0 if n_out <= 1 else (n_in - 1) / (n_out - 1)
    for i in range(n_out):
        x = scale * i
        x0 = int(np.floor(x))
        t = x - x0
        coeffs = (c2(t + 1.0), c1(t), c1(1.0 - t), c2(2.0 - t))
        for k in range(4):
            j = min(max(x0 - 1 + k, 0), n_in - 1)
            mat[i, j] += coeffs[k]
    return jnp.asarray(mat, dtype=jnp.float32)


def bicubic_upsample(x_nchw, factor):
    # TODO(synk): bicubic align_corners=True resampling stays in plain-JAX glue
    # (separable interpolation matmuls over only 3 channels -- no clean
    # lane-dense Pallas formulation at Cin=3).
    B, C, H, W = x_nchw.shape
    mh = _bicubic_matrix(H, H * factor)
    mw = _bicubic_matrix(W, W * factor)
    y = jnp.einsum('oh,bchw->bcow', mh, x_nchw)
    y = jnp.einsum('pw,bcow->bcop', mw, y)
    return y


# ---------------------------------------------------------------------------
# Full forward (Pallas pipeline) and pure-JAX reference
# ---------------------------------------------------------------------------
def early_conv_forward(x_nchw, layer_params, w_proj, up_sample):
    if up_sample > 1:
        x_nchw = bicubic_upsample(x_nchw, up_sample)
    x = jnp.transpose(x_nchw, (1, 0, 2, 3))               # (C, B, H, W): spatial on lanes
    n_layers = len(layer_params)
    for li, (w_mat, bias, alpha, stride) in enumerate(layer_params):
        proj = w_proj if li == n_layers - 1 else None     # fuse final 1x1 into last layer
        x = conv3x3_bn_prelu(x, w_mat, bias, alpha, stride, proj)
    return jnp.transpose(x, (1, 0, 2, 3))                 # back to NCHW


def early_conv_reference(x_nchw, raw_layers, strides, w_final, up_sample):
    """Pure-JAX (lax.conv) reference of the same eval-mode forward pass."""
    if up_sample > 1:
        x_nchw = bicubic_upsample(x_nchw, up_sample)
    x = jnp.transpose(x_nchw, (0, 2, 3, 1))
    for (w, gamma, beta, mean, var, alpha), stride in zip(raw_layers, strides):
        y = jax.lax.conv_general_dilated(
            x, jnp.transpose(w, (2, 3, 1, 0)),
            window_strides=(stride, stride), padding=((1, 1), (1, 1)),
            dimension_numbers=('NHWC', 'HWIO', 'NHWC'))
        s = gamma / jnp.sqrt(var + EPS)
        y = y * s + (beta - mean * s)
        x = jnp.where(y > 0, y, alpha * y)
    y = jax.lax.conv_general_dilated(
        x, jnp.transpose(w_final, (2, 3, 1, 0)),
        window_strides=(1, 1), padding=((0, 0), (0, 0)),
        dimension_numbers=('NHWC', 'HWIO', 'NHWC'))
    return jnp.transpose(y, (0, 3, 1, 2))


if __name__ == "__main__":
    # EarlyConv defaults: start_channel=24, depths=4, up_sample=2
    start_channel, depths, up_sample = 24, 4, 2
    in_channels = [3, start_channel, start_channel * 2, start_channel * 4]
    out_channels = [start_channel, start_channel * 2, start_channel * 4, start_channel * 8]
    strides = [2, 2, 2, 2]

    B, H, W = 2, 16, 16
    key = jax.random.PRNGKey(0)
    keys = jax.random.split(key, depths + 2)
    x = jax.random.normal(keys[0], (B, 3, H, W), dtype=jnp.float32)

    # Parameters matching the module's init (BN in eval mode, running stats).
    raw_layers = []
    for idx, (cin, cout) in enumerate(zip(in_channels, out_channels)):
        w = jax.random.normal(keys[idx + 1], (cout, cin, 3, 3), jnp.float32) * 0.1
        gamma = jnp.ones((cout,), jnp.float32)
        beta = jnp.zeros((cout,), jnp.float32)
        mean = jnp.zeros((cout,), jnp.float32)
        var = jnp.ones((cout,), jnp.float32)
        alpha = jnp.full((cout,), 0.25, jnp.float32)     # PReLU default init
        raw_layers.append((w, gamma, beta, mean, var, alpha))
    c_last = out_channels[-1]
    w_final = jax.random.normal(keys[depths + 1], (c_last, c_last, 1, 1),
                                jnp.float32) * 0.1

    # Fold BN into conv weights (no channel padding beyond sublane alignment).
    layer_params = []
    for (w, gamma, beta, mean, var, alpha), stride in zip(raw_layers, strides):
        w_mat, b, a = fold_conv_bn_prelu_params(w, gamma, beta, mean, var, alpha)
        layer_params.append((w_mat, b, a, stride))
    w_proj = fold_conv1x1_params(w_final)

    out = early_conv_forward(x, layer_params, w_proj, up_sample)
    out = jax.block_until_ready(out)

    ref = early_conv_reference(x, raw_layers, strides, w_final, up_sample)
    assert out.shape == ref.shape == (B, c_last, 2, 2), (out.shape, ref.shape)
    err = float(jnp.max(jnp.abs(out - ref)) / (jnp.max(jnp.abs(ref)) + 1e-6))
    assert err < 2e-2, f"relative error too large: {err}"

    print("KERNEL_OK")
</pallas_src>

<mosaic_0001>
module attributes {stable_mosaic.version = 11 : i64} {
  func.func @_conv_bn_prelu_kernel(%arg0: i32, %arg1: memref<24x72xf32, #tpu.memory_space<vmem>>, %arg2: memref<72x128xf32, #tpu.memory_space<vmem>>, %arg3: memref<24x1xf32, #tpu.memory_space<vmem>>, %arg4: memref<24x1xf32, #tpu.memory_space<vmem>>, %arg5: memref<24x128xf32, #tpu.memory_space<vmem>>) attributes {dimension_semantics = [#tpu.dimension_semantics<parallel>], iteration_bounds = array<i64: 4>, scalar_prefetch = 0 : i64, scratch_operands = 0 : i64, tpu.core_type = #tpu.core_type<tc>, window_params = [{pipeline_mode = #tpu.pipeline_mode<synchronous>, transform_indices = @transform_0, window_bounds = array<i64: 24, 72>}, {transform_indices = @transform_1, window_bounds = array<i64: 72, 128>}, {pipeline_mode = #tpu.pipeline_mode<synchronous>, transform_indices = @transform_2, window_bounds = array<i64: 24, 1>}, {pipeline_mode = #tpu.pipeline_mode<synchronous>, transform_indices = @transform_3, window_bounds = array<i64: 24, 1>}, {transform_indices = @transform_4, window_bounds = array<i64: 24, 128>}]} {
    %c0 = arith.constant 0 : index
    %c0_0 = arith.constant 0 : index
    %0 = vector.load %arg1[%c0, %c0_0] : memref<24x72xf32, #tpu.memory_space<vmem>>, vector<24x72xf32>
    %c0_1 = arith.constant 0 : index
    %c0_2 = arith.constant 0 : index
    %1 = vector.load %arg2[%c0_1, %c0_2] : memref<72x128xf32, #tpu.memory_space<vmem>>, vector<72x128xf32>
    %cst = arith.constant dense<0.000000e+00> : vector<24x128xf32>
    %2 = tpu.matmul %0, %1, %cst {dimension_numbers = #tpu.dot_dimension_numbers<[1], [0], [0], [1], [0, 0, 1, 1], [], []>} : vector<24x72xf32>, vector<72x128xf32>, vector<24x128xf32> -> vector<24x128xf32>
    %c0_3 = arith.constant 0 : index
    %c0_4 = arith.constant 0 : index
    %3 = vector.load %arg3[%c0_3, %c0_4] : memref<24x1xf32, #tpu.memory_space<vmem>>, vector<24x1xf32>
    %4 = vector.broadcast %3 : vector<24x1xf32> to vector<24x128xf32>
    %5 = arith.addf %2, %4 : vector<24x128xf32>
    %cst_5 = arith.constant 0.000000e+00 : f32
    %6 = vector.broadcast %cst_5 : f32 to vector<24x128xf32>
    %7 = arith.cmpf ogt, %5, %6 : vector<24x128xf32>
    %c0_6 = arith.constant 0 : index
    %c0_7 = arith.constant 0 : index
    %8 = vector.load %arg4[%c0_6, %c0_7] : memref<24x1xf32, #tpu.memory_space<vmem>>, vector<24x1xf32>
    %9 = vector.broadcast %8 : vector<24x1xf32> to vector<24x128xf32>
    %10 = arith.mulf %5, %9 : vector<24x128xf32>
    %11 = arith.select %7, %5, %10 : vector<24x128xi1>, vector<24x128xf32>
    %c0_8 = arith.constant 0 : index
    %c0_9 = arith.constant 0 : index
    %12 = vector.load %arg5[%c0_8, %c0_9] : memref<24x128xf32, #tpu.memory_space<vmem>>, vector<24x128xf32>
    tpu.vector_store %arg5[%c0_8, %c0_9], %11 {strides = array<i32>} : memref<24x128xf32, #tpu.memory_space<vmem>>, vector<24x128xf32>,
    return
  }
  func.func @transform_0(%arg0: i32) -> (i32, i32) {
    %c0_i32 = arith.constant 0 : i32
    %c0_i32_0 = arith.constant 0 : i32
    %c0_i32_1 = arith.constant 0 : i32
    return %c0_i32, %c0_i32_0 : i32, i32
  }
  func.func @transform_1(%arg0: i32) -> (i32, i32) {
    %c0_i32 = arith.constant 0 : i32
    %c0_i32_0 = arith.constant 0 : i32
    return %c0_i32, %arg0 : i32, i32
  }
  func.func @transform_2(%arg0: i32) -> (i32, i32) {
    %c0_i32 = arith.constant 0 : i32
    %c0_i32_0 = arith.constant 0 : i32
    %c0_i32_1 = arith.constant 0 : i32
    return %c0_i32, %c0_i32_0 : i32, i32
  }
  func.func @transform_3(%arg0: i32) -> (i32, i32) {
    %c0_i32 = arith.constant 0 : i32
    %c0_i32_0 = arith.constant 0 : i32
    %c0_i32_1 = arith.constant 0 : i32
    return %c0_i32, %c0_i32_0 : i32, i32
  }
  func.func @transform_4(%arg0: i32) -> (i32, i32) {
    %c0_i32 = arith.constant 0 : i32
    %c0_i32_0 = arith.constant 0 : i32
    return %c0_i32, %arg0 : i32, i32
  }
}

</mosaic_0001>

<bundles_post_ra>
// kernel: tpu_custom_call.1
= control target key start
LH: loop header
LB: loop body
LE: loop exit
PB: predicated region body
PF: predicated region fallthrough
CT: control target
= control target key end

     0   :  { %9 = vsyncpa [#allocation3], 0  ;;  %s917_s0 = inlined_call_operand.vmem [shape: f32[24,72], index: 0, kind: input, shape index: {}]   ;;  %s918_s1 = inlined_call_operand.hbm [shape: f32[72,512], index: 1, kind: input, shape index: {}]   ;;  %s919_s2 = inlined_call_operand.vmem [shape: f32[24,1], index: 2, kind: input, shape index: {}]   ;;  %s920_s3 = inlined_call_operand.vmem [shape: f32[24,1], index: 3, kind: input, shape index: {}]   ;;  %s921_s4 = inlined_call_operand.hbm [shape: f32[24,512], index: 4, kind: output, shape index: {}]  }
   0x1   :  { %11 = vsyncpa [#allocation3 + $0x1], 0 }
   0x2   :  { %12 = vsyncpa [#allocation4], 0 }
   0x3   :  { %14 = vsyncpa [#allocation4 + $0x1], 0  ;;  %s719_s15 = smov 0   ;;  %s721_s16 = smov 0  }
   0x4   :  { %s723_s17 = smov 0   ;;  %s725_s18 = smov 0  }
   0x5 LB: > { %s740_s19 = sadd.s32 4294967295, %s680_s18   ;;  %s451_s20 = sadd.s32 4294967294, %s680_s18   ;;  %s680_s18 = sphi %s725_s18, %s933_s18   ;;  %s676_s17 = sphi %s723_s17, %s932_s17   ;;  %s672_s16 = sphi %s721_s16, %s931_s16   ;;  %s668_s15 = sphi %s719_s15, %s930_s15  }
   0x6   : > { %s744_s21 = sadd.s32 1, %s680_s18   ;;  %s48_s22 = sadd.s32 1, %s676_s17 }
   0x7   : > { %s45_s23 = ssub.s32 %s680_s18, %s744_s21  ;;  %p55_p0 = scmp.ne.s32.totalorder %s676_s17, %s672_s16 }
   0x8   : > { %p46_p1 = scmp.eq.s32.totalorder %s45_s23, 0  ;;  %p56_p2 = scmp.eq.s32.totalorder %s680_s18, 0 }
   0x9   : > { %p61_p3 = scmp.ne.s32.totalorder %s672_s16, %s668_s15  ;;  %p62_p4 = scmp.eq.s32.totalorder %s740_s19, 0 }
   0xa   : > { %s756_s24 = scalar_select %p46_p1, %s676_s17, %s48_s22  }
   0xb   : > { %p57_p5 = por %p56_p2, %p55_p0  ;;  %p758_p6 = por %p62_p4, %p61_p3 }
   0xc   : > { %p127_p7 = scmp.eq.s32.totalorder %s740_s19, 3  ;;  %p133_p8 = scmp.eq.s32.totalorder %s451_s20, 3 }
   0xd   : > { %p538_p9 = scmp.lt.s32.totalorder %s680_s18, 4  ;;  %s162_s28 = sand.u32 1, %s676_s17  }
   0xe   : > { %p764_p10 = por %p127_p7, %p55_p0  ;;  %p768_p11 = por %p133_p8, %p61_p3 }
   0xf   : > { %s454_s29 = sshll.u32 %s680_s18, 7  ;;  %s523_s30 = smul.u32 72, %s162_s28 }
  0x10   : > { %s924_s26 = scalar_select %p764_p10, 1, 0 }
  0x11   : > { %s925_s27 = scalar_select %p768_p11, 1, 0 }
  0x12   : > { %s777_s7 = scalar_lea.hbm %s918_s1, %s454_s29  ;;  %p779_p12 = pnand %p538_p9, %p57_p5 }
  0x13   : > { %s166_s9 = scalar_lea.vmem [#allocation2], %s523_s30  ;;  %s786_s11 = scalar_lea.sflag [#allocation3], %s162_s28 }
  0x14   : > { %s172_s10 = sshll.u32 %s166_s9, 4  ;;  %s584_s12 = scalar_lea.hbm %s777_s7, 1152  ;;  %s783_s10 = int_to_ptr.vmem [resolvable:$true] %s172_s10 }
  0x15   : > { %p585_p0 = scmp.ne.s32.totalorder %s777_s7, %s584_s12  ;;  %p586_p1 = pneg %p779_p12 }
  0x16   : > { %s589_s20 = scalar_lea.hbm %s918_s1, 4608  ;;  %p590_p4 = scmp.lt.u32.totalorder %s777_s7, %s918_s1 }
  0x17   : > { %p587_p2 = pnand %p586_p1, %p585_p0  ;;  %p591_p5 = scmp.lt.u32.totalorder %s589_s20, %s584_s12 }
  0x18   : > { %p593_p8 = scmp.lt.u32.totalorder %s584_s12, %s777_s7 }
  0x19   : > { %p588_p3 = pneg %p587_p2  ;;  %p592_p7 = por %p591_p5, %p590_p4 }
  0x1b   : > { %p594_p9 = por %p593_p8, %p592_p7 }
  0x1d   : > { %p595_p13 = pnand %p594_p9, %p588_p3 }
  0x1f   : > { %598 = shalt.err (!%p595_p13)
}
  0x20   : > { %s599_s28 = scalar_lea.vmem %s783_s10, 1152  ;;  %s682_s29 = smov [#allocation2]  }
  0x21   : > { %p600_p0 = scmp.ne.s32.totalorder %s783_s10, %s599_s28  ;;  %s604_s30 = sshll.u32 %s682_s29, 4  ;;  %s605_s30 = int_to_ptr.vmem [resolvable:$false] %s604_s30 }
  0x22   : > { %s606_s5 = scalar_lea.vmem %s605_s30, 2304  ;;  %p607_p10 = scmp.lt.s32.totalorder %s783_s10, %s605_s30 }
  0x23   : > { %p602_p2 = pnand %p600_p0, %p586_p1  ;;  %p608_p4 = scmp.lt.s32.totalorder %s606_s5, %s599_s28 }
  0x25   : > { %p603_p11 = pneg %p602_p2  ;;  %p609_p5 = por %p608_p4, %p607_p10 }
  0x27   : > { %p610_p7 = pnand %p609_p5, %p603_p11 }
  0x29   : > { %613 = shalt.err (!%p610_p7)
}
  0x2a   : > { %s683_s6 = smov 512   ;;  %s684_s9 = smov 128  }
  0x2b   : > { %s685_s12 = smov 8   ;;  %p180_p13 = scmp.lt.s32.totalorder %s680_s18, 5 }
  0x2c   : > { %533 = dma.hbm_to_vmem [thread:$0]  (!%p779_p12), %s777_s7, 1152, %s783_s10, %s786_s11, %s683_s6, %s684_s9, %s685_s12  }
  0x2d   : > { %p927_p1 = scmp.ge.s32.totalorder %s680_s18, 1 }
  0x2f   : > { %p181_p3 = pnand %p927_p1, %p180_p13 }
  0x30   : > { %s818_s13 = sand.u32 (!%p181_p3), 1, %s672_s16  }
  0x31   : > { %184 = sbr.rel (%p181_p3) target bundleno = 315 (0x13b), region = 36  ;;  %s187_s20 = scalar_lea.sflag (!%p181_p3), [#allocation3], %s818_s13 }
  0x32   : > { %s524_s14 = smul.u32 (!%p181_p3), 72, %s818_s13 }
  0x34   : > { %s822_s22 = scalar_lea.vmem (!%p181_p3), [#allocation2], %s524_s14 }
  0x38   : > { %659 = dma.done.wait (%p758_p6), %s187_s20, 1152  }
  0x39   : > { %661 = vsyncadd (%p758_p6), %s187_s20, 4294966144  ;;  %v686_v0 = vmov 0.0|0.0   ;;  %vm687_vm0 = vmmov 0   ;;  %v688_v1 = vmov 0.0   ;;  %v689_v2 = vmov 0   ;;  %v218_v3 = vld [vmem:[%s822_s22] sm:$0xff] }
  0x3a   : > { %501 = vmatprep.subr.bf16.mxu0 %v686_v0  ;;  %513 = vmatprep.subr.bf16.mxu1 %v686_v0  ;;  %v219_v4 = vld [vmem:[%s822_s22 + $0x8] sm:$0xff]  ;;  %v220_v5 = vld [vmem:[%s822_s22 + $0x10] sm:$0xff]  ;;  %v221_v7 = vld [vmem:[%s822_s22 + $0x18] sm:$0xff]  ;;  %vm245_vm1 = vcmask 588800   ;;  %s459_s23 = sshll.u32 %s740_s19, 7  ;;  %s366_s19 = scalar_lea.sflag [#allocation4], %s818_s13 }
  0x3b   : > { %492 = vmatprep.mubr.msk.f32.mxu0 %vm687_vm0, %v688_v1  ;;  %495 = vmatprep.mubr.msk.f32.mxu1 %vm687_vm0, %v688_v1  ;;  %v502_v6 = vpack.c.bf16 %v219_v4, %v218_v3  ;;  %v505_v8 = vpack.c.bf16 %v221_v7, %v220_v5  ;;  %v222_v9 = vld [vmem:[%s822_s22 + $0x20] sm:$0xff]  ;;  %v223_v10 = vld [vmem:[%s822_s22 + $0x28] sm:$0xff]  ;;  %v224_v16 = vld [vmem:[%s822_s22 + $0x30] sm:$0xff]  ;;  %s874_s30 = scalar_lea.hbm %s921_s4, %s459_s23  ;;  %p928_p10 = scmp.ne.s32.totalorder %s924_s26, 0 }
  0x3c   : > { %583 = vset.pattern.permute.xlu1 %v689_v2  ;;  %582 = vset.pattern.permute.xlu0 %v689_v2  ;;  %v229_v11 = vld [vmem:[%s919_s2 + $0x10] sm:$0xff]  ;;  %v227_v12 = vld [vmem:[%s919_s2] sm:$0xff]  ;;  %v228_v14 = vld [vmem:[%s919_s2 + $0x8] sm:$0xff]  ;;  %v508_v15 = vpack.c.bf16 %v223_v10, %v222_v9  ;;  %s690_s6 = smov [#allocation5]  }
  0x3d   : > { %503 = vmatpush3.bf16.msra.mxu0 %v502_v6  ;;  %518 = vmatpush3.bf16.msra.mxu1 %v502_v6  ;;  %v338_v13 = vld [vmem:[%s920_s3] sm:$0xff]  ;;  %v340_v18 = vld [vmem:[%s920_s3 + $0x10] sm:$0xff]  ;;  %v339_v19 = vld [vmem:[%s920_s3 + $0x8] sm:$0xff]  ;;  %s618_s9 = sshll.u32 %s690_s6, 4  ;;  %s619_s9 = int_to_ptr.vmem [resolvable:$false] %s618_s9 }
  0x3e   : > { %504 = vmatprep.subr.bf16.mxu0 %v686_v0  ;;  %514 = vmatprep.subr.bf16.mxu1 %v686_v0  ;;  %v225_v17 = vld [vmem:[%s822_s22 + $0x38] sm:$0xff]  ;;  %v226_v21 = vld [vmem:[%s822_s22 + $0x40] sm:$0xff]  ;;  %v217_v24 = vld [vmem:[%s917_s0 + $0x10] sm:$0xff]  ;;  %s525_s22 = smul.u32 24, %s818_s13  ;;  %s620_s12 = scalar_lea.vmem %s619_s9, 768 }
  0x3f   : > { %242 = vperm.xlu1 %583, %v229_v11   ;;  %232 = vperm.xlu0 %582, %v227_v12   ;;  %v511_v20 = vpack.c.bf16 %v225_v17, %v224_v16  ;;  %v215_v22 = vld [vmem:[%s917_s0] sm:$0xff]  ;;  %v216_v23 = vld [vmem:[%s917_s0 + $0x8] sm:$0xff] }
  0x40   : > { %s214_s10 = scalar_lea.vmem [#allocation5], %s525_s22 }
  0x41   : > { %506 = vmatpush3.bf16.msra.mxu0 %v505_v8  ;;  %519 = vmatpush3.bf16.msra.mxu1 %v505_v8  ;;  %s378_s11 = sshll.u32 %s214_s10, 4  ;;  %s869_s11 = int_to_ptr.vmem [resolvable:$true] %s378_s11 }
  0x42   : > { %507 = vmatprep.subr.bf16.mxu0 %v686_v0  ;;  %515 = vmatprep.subr.bf16.mxu1 %v686_v0  ;;  %s614_s5 = scalar_lea.vmem %s869_s11, 384  ;;  %p621_p8 = scmp.lt.s32.totalorder %s869_s11, %s619_s9 }
  0x43   : > { %343 = vperm.xlu1 %583, %v338_v13   ;;  %237 = vperm.xlu0 %582, %v228_v14   ;;  %p615_p6 = scmp.ne.s32.totalorder %s869_s11, %s614_s5  ;;  %p622_p9 = scmp.lt.s32.totalorder %s620_s12, %s614_s5 }
  0x45   : > { %509 = vmatpush3.bf16.msra.mxu0 %v508_v15  ;;  %520 = vmatpush3.bf16.msra.mxu1 %v508_v15  ;;  %p616_p11 = pnand %p615_p6, %p928_p10  ;;  %p623_p0 = por %p622_p9, %p621_p8 }
  0x46   : > { %510 = vmatprep.subr.bf16.mxu0 %v686_v0  ;;  %516 = vmatprep.subr.bf16.mxu1 %v686_v0 }
  0x47   : > { %353 = vperm.xlu1 %583, %v340_v18   ;;  %348 = vperm.xlu0 %582, %v339_v19   ;;  %p617_p12 = pneg %p616_p11 }
  0x49   : > { %512 = vmatpush3.bf16.msra.mxu0 %v511_v20  ;;  %521 = vmatpush3.bf16.msra.mxu1 %v511_v20  ;;  %p624_p2 = pnand %p623_p0, %p617_p12 }
  0x4a   : > { %490 = vmatprep.subr.mxu0 %v688_v1  ;;  %517 = vmatprep.subr.mxu1 %v688_v1 }
  0x4d   : > { %491 = vmatpush3.msra.mxu0 %v226_v21  ;;  %522 = vmatpush3.msra.mxu1 %v226_v21 }
  0x4e   : > { %493 = vmatmul.mubr.msk.f32.vlgmr.msra.gmra.mrb[0].mxu0 %vm245_vm1, %v215_v22  ;;  %496 = vmatmul.mubr.msk.f32.vlgmr.msra.gmra.mrb[0].mxu1 %vm245_vm1, %v216_v23 }
  0x4f   : > { %498 = vmatprep.mubr.msk.f32.mxu1 %vm687_vm0, %v688_v1 }
  0x52   : > { %499 = vmatmul.mubr.msk.f32.gmra.mrb[2].mxu1 %vm245_vm1, %v217_v24 }
  0xbe   : > { %v233_v25 = vpop.permute.xlu0 %232  ;;  %v243_v26 = vpop.permute.xlu1 %242 }
  0xc2   : > { %v238_v27 = vpop.permute.xlu0 %237  ;;  %v344_v28 = vpop.permute.xlu1 %343 }
  0xc6   : > { %v349_v35 = vpop.permute.xlu0 %348  ;;  %v354_v43 = vpop.permute.xlu1 %353 }
 0x121   : > { %v321_v29 = vpop.f32.mrb[0].mxu0  ;;  %v326_v30 = vpop.f32.mrb[0].mxu1 }
 0x122   : > { %v322_v31 = vadd.f32 %v321_v29, %v233_v25  ;;  %v327_v32 = vadd.f32 %v326_v30, %v238_v27  ;;  %v497_v33 = vpop.f32.mrb[1].mxu1  ;;  %v494_v34 = vpop.f32.mrb[1].mxu0 }
 0x124   : > { %vm335_vm2 = vcmp.gt.f32.partialorder %v322_v31, 0.0  ;;  %v356_v36 = vmul.f32 %v344_v28, %v322_v31  ;;  %vm336_vm3 = vcmp.gt.f32.partialorder %v327_v32, 0.0  ;;  %v357_v37 = vmul.f32 %v349_v35, %v327_v32 }
 0x125   : > { %v331_v38 = vpop.f32.mrb[2].mxu1 }
 0x126   : > { %v359_v39 = vsel %vm335_vm2, %v322_v31, %v356_v36  ;;  %v360_v40 = vsel %vm336_vm3, %v327_v32, %v357_v37  ;;  %v332_v41 = vadd.f32 %v331_v38, %v243_v26  ;;  %v500_v42 = vpop.f32.mrb[3].mxu1 }
 0x127   : > { %362 = vst [vmem:[%s214_s10] sm:$0xff] %v359_v39  ;;  %363 = vst [vmem:[%s214_s10 + $0x8] sm:$0xff] %v360_v40 }
 0x128   : > { %vm337_vm4 = vcmp.gt.f32.partialorder %v332_v41, 0.0  ;;  %v358_v44 = vmul.f32 %v354_v43, %v332_v41 }
 0x12a   : > { %v361_v45 = vsel %vm337_vm4, %v332_v41, %v358_v44 }
 0x12b   : > { %364 = vst [vmem:[%s214_s10 + $0x10] sm:$0xff] %v361_v45 }
 0x12c   : > { %627 = shalt.err (!%p624_p2)
}
 0x12d   : > { %s628_s14 = scalar_lea.hbm %s874_s30, 384  ;;  %s632_s7 = scalar_lea.hbm %s921_s4, 1536 }
 0x12e   : > { %p629_p4 = scmp.ne.s32.totalorder %s874_s30, %s628_s14  ;;  %p633_p13 = scmp.lt.u32.totalorder %s874_s30, %s921_s4 }
 0x12f   : > { %p634_p1 = scmp.lt.u32.totalorder %s632_s7, %s628_s14  ;;  %p636_p6 = scmp.lt.u32.totalorder %s628_s14, %s874_s30 }
 0x130   : > { %p630_p5 = pnand %p629_p4, %p928_p10 }
 0x131   : > { %p635_p3 = por %p634_p1, %p633_p13 }
 0x132   : > { %p631_p7 = pneg %p630_p5 }
 0x133   : > { %p637_p11 = por %p636_p6, %p635_p3 }
 0x135   : > { %p638_p12 = pnand %p637_p11, %p631_p7 }
 0x137   : > { %641 = shalt.err (!%p638_p12)
}
 0x138   : > { %s691_s10 = smov 128   ;;  %s692_s23 = smov 512  }
 0x139   : > { %s693_s28 = smov 8  }
 0x13a   : > { %528 = dma.vmem_to_hbm [thread:$0]  (%p928_p10), %s869_s11, 384, %s874_s30, %s366_s19, %s691_s10, %s692_s23, %s693_s28  }
 0x13b PF: > { %p539_p8 = scmp.ge.s32.totalorder %s680_s18, 2  ;;  %s393_s29 = sand.u32 1, %s668_s15  }
 0x13c   : > { %p929_p9 = scmp.ne.s32.totalorder %s925_s27, 0  ;;  %s394_s5 = scalar_lea.sflag [#allocation4], %s393_s29 }
 0x13e   : > { %p535_p0 = pnand %p539_p8, %p929_p9 }
 0x140   : > { %663 = dma.done.wait (!%p535_p0), %s394_s5, 384  }
 0x141   : > { %665 = vsyncadd (!%p535_p0), %s394_s5, 4294966912  ;;  %p17_p2 = scmp.ge.s32.totalorder %s744_s21, 6   ;;  %s930_s15 = smov %s672_s16 }
 0x142   : > { %s931_s16 = smov %s676_s17  ;;  %s932_s17 = smov %s756_s24 }
 0x143   : > { %s933_s18 = smov %s744_s21  ;;  %19 = sbr.rel (!%p17_p2) target bundleno = 5 (0x5), region = 81 }
 0x14a   :  { %399 = vsyncpa [#allocation3], 1 }
 0x14b   :  { %401 = vsyncpa [#allocation3 + $0x1], 1 }
 0x14c   :  { %402 = vsyncpa [#allocation4], 1 }
 0x14d   :  { %404 = vsyncpa [#allocation4 + $0x1], 1 }

</bundles_post_ra>
